<compile_context>
chip_gen: v7x
topology: tpu7x:2x2x1
jax: 0.10.0
libtpu: 0.0.40
codegen_flags: <defaults>
</compile_context>

<pallas_src>
import jax
import jax.numpy as jnp
from jax.experimental import pallas as pl
from jax.experimental.pallas import tpu as pltpu
import numpy as np

LANE = 128


def _row_gather_kernel(*refs):
    """refs = (idx_smem_ref, row_ref_0, ..., row_ref_{R-1}, out_ref).

    Each row_ref is a (1, 1, D_pad) VMEM tile holding one embedding row that
    the BlockSpec machinery already DMA'd (data-dependently, via the
    scalar-prefetched indices). The body just lays the R rows into the
    (R, D_pad) output tile with static, lane-dense stores.
    """
    rows = refs[1:-1]
    out_ref = refs[-1]
    for k, row_ref in enumerate(rows):          # unrolled at trace time
        out_ref[pl.ds(k, 1), :] = row_ref[0]    # (1, D_pad) lane-dense store


def my_embedding(input_idx, embedding_matrix, *, rows_per_block=8):
    """JAX/Pallas equivalent of myEmbedding.forward (advanced-index gather)."""
    V, D = embedding_matrix.shape
    orig_shape = input_idx.shape
    dtype = embedding_matrix.dtype

    flat = input_idx.reshape(-1).astype(jnp.int32)
    N = flat.shape[0]
    if N == 0:  # empty index tensor: nothing to gather
        return jnp.zeros((*orig_shape, D), dtype)

    # Rows gathered per grid step (multiple of 8 so the output tile obeys the
    # (8, 128) rule). Raise for large token counts to amortize per-step cost.
    R = max(8, (rows_per_block // 8) * 8)
    n_pad = ((N + R - 1) // R) * R
    num_blocks = n_pad // R

    # Pad indices with 0 (a valid row). Padded rows are sliced off below, so
    # no clip is needed inside the kernel (and genuine OOB indices are not
    # silently clamped).
    idx_p = jnp.zeros((n_pad,), jnp.int32).at[:N].set(flat)

    # Lane-dense output: pad D to a multiple of 128. For real embedding dims
    # (already 128-multiples) this is a no-op and the table is not copied.
    d_pad = ((D + LANE - 1) // LANE) * LANE
    emb = embedding_matrix if d_pad == D else jnp.pad(
        embedding_matrix, ((0, 0), (0, d_pad - D)))
    # (V, 1, d_pad): the unit second-minor dim makes the (1, 1, d_pad) row
    # block trivially satisfy the (8, 128) tiling rule for any V.
    emb3 = emb.reshape(V, 1, d_pad)

    def make_row_map(r):
        # index_map gets (grid_i, *scalar_prefetch_refs) and returns BLOCK
        # indices; block row size is 1, so the block index IS the token id.
        return lambda i, idx_ref, r=r: (idx_ref[i * R + r], 0, 0)

    in_specs = [pl.BlockSpec((1, 1, d_pad), make_row_map(r)) for r in range(R)]

    out_padded = pl.pallas_call(
        _row_gather_kernel,
        out_shape=jax.ShapeDtypeStruct((n_pad, d_pad), dtype),
        grid_spec=pltpu.PrefetchScalarGridSpec(
            num_scalar_prefetch=1,
            grid=(num_blocks,),
            in_specs=in_specs,
            out_specs=pl.BlockSpec((R, d_pad), lambda i, idx_ref: (i, 0)),
        ),
        compiler_params=pltpu.CompilerParams(
            dimension_semantics=("parallel",)),
    )(idx_p, *([emb3] * R))

    return out_padded[:N, :D].reshape(*orig_shape, D)


if __name__ == "__main__":
    vocab_size = 30        # stands in for len(vocal)
    embedding_dim = 10     # as in the PyTorch module

    key = jax.random.PRNGKey(0)
    k_emb, k_idx, k_idx2 = jax.random.split(key, 3)

    # Deterministic parameter init (mirrors nn.Parameter(torch.randn(V, D)))
    embedding_matrix = jax.random.normal(
        k_emb, (vocab_size, embedding_dim), dtype=jnp.float32)

    # Primary example input: batch=2, seq=8 integer indices into the vocab.
    input_idx = jax.random.randint(
        k_idx, (2, 8), minval=0, maxval=vocab_size, dtype=jnp.int32)

    out = my_embedding(input_idx, embedding_matrix)
    out = jax.block_until_ready(out)

    ref = embedding_matrix[input_idx]
    np.testing.assert_allclose(np.asarray(out), np.asarray(ref),
                               rtol=0.0, atol=0.0)
    assert out.shape == (2, 8, embedding_dim)
    assert out.dtype == embedding_matrix.dtype

    # Secondary check: larger, non-multiple-of-8 N exercises the multi-block
    # grid path and the N/D padding logic.
    input_idx2 = jax.random.randint(
        k_idx2, (4, 37), minval=0, maxval=vocab_size, dtype=jnp.int32)
    out2 = jax.block_until_ready(my_embedding(input_idx2, embedding_matrix))
    np.testing.assert_allclose(np.asarray(out2),
                               np.asarray(embedding_matrix[input_idx2]),
                               rtol=0.0, atol=0.0)
    assert out2.shape == (4, 37, embedding_dim)

    print("KERNEL_OK")
</pallas_src>

<mosaic_0001>
module attributes {stable_mosaic.version = 11 : i64} {
  func.func @_row_gather_kernel(%arg0: i32, %arg1: memref<16xi32, #tpu.memory_space<smem>>, %arg2: memref<1x1x128xf32, #tpu.memory_space<vmem>>, %arg3: memref<1x1x128xf32, #tpu.memory_space<vmem>>, %arg4: memref<1x1x128xf32, #tpu.memory_space<vmem>>, %arg5: memref<1x1x128xf32, #tpu.memory_space<vmem>>, %arg6: memref<1x1x128xf32, #tpu.memory_space<vmem>>, %arg7: memref<1x1x128xf32, #tpu.memory_space<vmem>>, %arg8: memref<1x1x128xf32, #tpu.memory_space<vmem>>, %arg9: memref<1x1x128xf32, #tpu.memory_space<vmem>>, %arg10: memref<8x128xf32, #tpu.memory_space<vmem>>) attributes {dimension_semantics = [#tpu.dimension_semantics<parallel>], iteration_bounds = array<i64: 2>, scalar_prefetch = 1 : i64, scratch_operands = 0 : i64, tpu.core_type = #tpu.core_type<tc>, window_params = [{transform_indices = @transform_0, window_bounds = array<i64: 1, 1, 128>}, {transform_indices = @transform_1, window_bounds = array<i64: 1, 1, 128>}, {transform_indices = @transform_2, window_bounds = array<i64: 1, 1, 128>}, {transform_indices = @transform_3, window_bounds = array<i64: 1, 1, 128>}, {transform_indices = @transform_4, window_bounds = array<i64: 1, 1, 128>}, {transform_indices = @transform_5, window_bounds = array<i64: 1, 1, 128>}, {transform_indices = @transform_6, window_bounds = array<i64: 1, 1, 128>}, {transform_indices = @transform_7, window_bounds = array<i64: 1, 1, 128>}, {transform_indices = @transform_8, window_bounds = array<i64: 8, 128>}]} {
    %c0 = arith.constant 0 : index
    %c0_0 = arith.constant 0 : index
    %c0_1 = arith.constant 0 : index
    %0 = vector.load %arg2[%c0, %c0_0, %c0_1] : memref<1x1x128xf32, #tpu.memory_space<vmem>>, vector<1x1x128xf32>
    %1 = vector.shape_cast %0 : vector<1x1x128xf32> to vector<1x128xf32>
    %c0_2 = arith.constant 0 : index
    %c0_3 = arith.constant 0 : index
    %2 = vector.load %arg10[%c0_2, %c0_3] : memref<8x128xf32, #tpu.memory_space<vmem>>, vector<1x128xf32>
    tpu.vector_store %arg10[%c0_2, %c0_3], %1 {strides = array<i32>} : memref<8x128xf32, #tpu.memory_space<vmem>>, vector<1x128xf32>,
    %c0_4 = arith.constant 0 : index
    %c0_5 = arith.constant 0 : index
    %c0_6 = arith.constant 0 : index
    %3 = vector.load %arg3[%c0_4, %c0_5, %c0_6] : memref<1x1x128xf32, #tpu.memory_space<vmem>>, vector<1x1x128xf32>
    %4 = vector.shape_cast %3 : vector<1x1x128xf32> to vector<1x128xf32>
    %c1 = arith.constant 1 : index
    %c0_7 = arith.constant 0 : index
    %5 = vector.load %arg10[%c1, %c0_7] : memref<8x128xf32, #tpu.memory_space<vmem>>, vector<1x128xf32>
    tpu.vector_store %arg10[%c1, %c0_7], %4 {strides = array<i32>} : memref<8x128xf32, #tpu.memory_space<vmem>>, vector<1x128xf32>,
    %c0_8 = arith.constant 0 : index
    %c0_9 = arith.constant 0 : index
    %c0_10 = arith.constant 0 : index
    %6 = vector.load %arg4[%c0_8, %c0_9, %c0_10] : memref<1x1x128xf32, #tpu.memory_space<vmem>>, vector<1x1x128xf32>
    %7 = vector.shape_cast %6 : vector<1x1x128xf32> to vector<1x128xf32>
    %c2 = arith.constant 2 : index
    %c0_11 = arith.constant 0 : index
    %8 = vector.load %arg10[%c2, %c0_11] : memref<8x128xf32, #tpu.memory_space<vmem>>, vector<1x128xf32>
    tpu.vector_store %arg10[%c2, %c0_11], %7 {strides = array<i32>} : memref<8x128xf32, #tpu.memory_space<vmem>>, vector<1x128xf32>,
    %c0_12 = arith.constant 0 : index
    %c0_13 = arith.constant 0 : index
    %c0_14 = arith.constant 0 : index
    %9 = vector.load %arg5[%c0_12, %c0_13, %c0_14] : memref<1x1x128xf32, #tpu.memory_space<vmem>>, vector<1x1x128xf32>
    %10 = vector.shape_cast %9 : vector<1x1x128xf32> to vector<1x128xf32>
    %c3 = arith.constant 3 : index
    %c0_15 = arith.constant 0 : index
    %11 = vector.load %arg10[%c3, %c0_15] : memref<8x128xf32, #tpu.memory_space<vmem>>, vector<1x128xf32>
    tpu.vector_store %arg10[%c3, %c0_15], %10 {strides = array<i32>} : memref<8x128xf32, #tpu.memory_space<vmem>>, vector<1x128xf32>,
    %c0_16 = arith.constant 0 : index
    %c0_17 = arith.constant 0 : index
    %c0_18 = arith.constant 0 : index
    %12 = vector.load %arg6[%c0_16, %c0_17, %c0_18] : memref<1x1x128xf32, #tpu.memory_space<vmem>>, vector<1x1x128xf32>
    %13 = vector.shape_cast %12 : vector<1x1x128xf32> to vector<1x128xf32>
    %c4 = arith.constant 4 : index
    %c0_19 = arith.constant 0 : index
    %14 = vector.load %arg10[%c4, %c0_19] : memref<8x128xf32, #tpu.memory_space<vmem>>, vector<1x128xf32>
    tpu.vector_store %arg10[%c4, %c0_19], %13 {strides = array<i32>} : memref<8x128xf32, #tpu.memory_space<vmem>>, vector<1x128xf32>,
    %c0_20 = arith.constant 0 : index
    %c0_21 = arith.constant 0 : index
    %c0_22 = arith.constant 0 : index
    %15 = vector.load %arg7[%c0_20, %c0_21, %c0_22] : memref<1x1x128xf32, #tpu.memory_space<vmem>>, vector<1x1x128xf32>
    %16 = vector.shape_cast %15 : vector<1x1x128xf32> to vector<1x128xf32>
    %c5 = arith.constant 5 : index
    %c0_23 = arith.constant 0 : index
    %17 = vector.load %arg10[%c5, %c0_23] : memref<8x128xf32, #tpu.memory_space<vmem>>, vector<1x128xf32>
    tpu.vector_store %arg10[%c5, %c0_23], %16 {strides = array<i32>} : memref<8x128xf32, #tpu.memory_space<vmem>>, vector<1x128xf32>,
    %c0_24 = arith.constant 0 : index
    %c0_25 = arith.constant 0 : index
    %c0_26 = arith.constant 0 : index
    %18 = vector.load %arg8[%c0_24, %c0_25, %c0_26] : memref<1x1x128xf32, #tpu.memory_space<vmem>>, vector<1x1x128xf32>
    %19 = vector.shape_cast %18 : vector<1x1x128xf32> to vector<1x128xf32>
    %c6 = arith.constant 6 : index
    %c0_27 = arith.constant 0 : index
    %20 = vector.load %arg10[%c6, %c0_27] : memref<8x128xf32, #tpu.memory_space<vmem>>, vector<1x128xf32>
    tpu.vector_store %arg10[%c6, %c0_27], %19 {strides = array<i32>} : memref<8x128xf32, #tpu.memory_space<vmem>>, vector<1x128xf32>,
    %c0_28 = arith.constant 0 : index
    %c0_29 = arith.constant 0 : index
    %c0_30 = arith.constant 0 : index
    %21 = vector.load %arg9[%c0_28, %c0_29, %c0_30] : memref<1x1x128xf32, #tpu.memory_space<vmem>>, vector<1x1x128xf32>
    %22 = vector.shape_cast %21 : vector<1x1x128xf32> to vector<1x128xf32>
    %c7 = arith.constant 7 : index
    %c0_31 = arith.constant 0 : index
    %23 = vector.load %arg10[%c7, %c0_31] : memref<8x128xf32, #tpu.memory_space<vmem>>, vector<1x128xf32>
    tpu.vector_store %arg10[%c7, %c0_31], %22 {strides = array<i32>} : memref<8x128xf32, #tpu.memory_space<vmem>>, vector<1x128xf32>,
    return
  }
  func.func @transform_0(%arg0: i32, %arg1: memref<16xi32, #tpu.memory_space<smem>>) -> (i32, i32, i32) {
    %c8_i32 = arith.constant 8 : i32
    %0 = arith.muli %arg0, %c8_i32 : i32
    %c0_i32 = arith.constant 0 : i32
    %1 = arith.addi %0, %c0_i32 : i32
    %2 = arith.index_cast %1 : i32 to index
    %3 = memref.load %arg1[%2] : memref<16xi32, #tpu.memory_space<smem>>
    %c0_i32_0 = arith.constant 0 : i32
    %c0_i32_1 = arith.constant 0 : i32
    %c0_i32_2 = arith.constant 0 : i32
    return %3, %c0_i32_0, %c0_i32_1 : i32, i32, i32
  }
  func.func @transform_1(%arg0: i32, %arg1: memref<16xi32, #tpu.memory_space<smem>>) -> (i32, i32, i32) {
    %c8_i32 = arith.constant 8 : i32
    %0 = arith.muli %arg0, %c8_i32 : i32
    %c1_i32 = arith.constant 1 : i32
    %1 = arith.addi %0, %c1_i32 : i32
    %2 = arith.index_cast %1 : i32 to index
    %3 = memref.load %arg1[%2] : memref<16xi32, #tpu.memory_space<smem>>
    %c0_i32 = arith.constant 0 : i32
    %c0_i32_0 = arith.constant 0 : i32
    %c0_i32_1 = arith.constant 0 : i32
    return %3, %c0_i32, %c0_i32_0 : i32, i32, i32
  }
  func.func @transform_2(%arg0: i32, %arg1: memref<16xi32, #tpu.memory_space<smem>>) -> (i32, i32, i32) {
    %c8_i32 = arith.constant 8 : i32
    %0 = arith.muli %arg0, %c8_i32 : i32
    %c2_i32 = arith.constant 2 : i32
    %1 = arith.addi %0, %c2_i32 : i32
    %2 = arith.index_cast %1 : i32 to index
    %3 = memref.load %arg1[%2] : memref<16xi32, #tpu.memory_space<smem>>
    %c0_i32 = arith.constant 0 : i32
    %c0_i32_0 = arith.constant 0 : i32
    %c0_i32_1 = arith.constant 0 : i32
    return %3, %c0_i32, %c0_i32_0 : i32, i32, i32
  }
  func.func @transform_3(%arg0: i32, %arg1: memref<16xi32, #tpu.memory_space<smem>>) -> (i32, i32, i32) {
    %c8_i32 = arith.constant 8 : i32
    %0 = arith.muli %arg0, %c8_i32 : i32
    %c3_i32 = arith.constant 3 : i32
    %1 = arith.addi %0, %c3_i32 : i32
    %2 = arith.index_cast %1 : i32 to index
    %3 = memref.load %arg1[%2] : memref<16xi32, #tpu.memory_space<smem>>
    %c0_i32 = arith.constant 0 : i32
    %c0_i32_0 = arith.constant 0 : i32
    %c0_i32_1 = arith.constant 0 : i32
    return %3, %c0_i32, %c0_i32_0 : i32, i32, i32
  }
  func.func @transform_4(%arg0: i32, %arg1: memref<16xi32, #tpu.memory_space<smem>>) -> (i32, i32, i32) {
    %c8_i32 = arith.constant 8 : i32
    %0 = arith.muli %arg0, %c8_i32 : i32
    %c4_i32 = arith.constant 4 : i32
    %1 = arith.addi %0, %c4_i32 : i32
    %2 = arith.index_cast %1 : i32 to index
    %3 = memref.load %arg1[%2] : memref<16xi32, #tpu.memory_space<smem>>
    %c0_i32 = arith.constant 0 : i32
    %c0_i32_0 = arith.constant 0 : i32
    %c0_i32_1 = arith.constant 0 : i32
    return %3, %c0_i32, %c0_i32_0 : i32, i32, i32
  }
  func.func @transform_5(%arg0: i32, %arg1: memref<16xi32, #tpu.memory_space<smem>>) -> (i32, i32, i32) {
    %c8_i32 = arith.constant 8 : i32
    %0 = arith.muli %arg0, %c8_i32 : i32
    %c5_i32 = arith.constant 5 : i32
    %1 = arith.addi %0, %c5_i32 : i32
    %2 = arith.index_cast %1 : i32 to index
    %3 = memref.load %arg1[%2] : memref<16xi32, #tpu.memory_space<smem>>
    %c0_i32 = arith.constant 0 : i32
    %c0_i32_0 = arith.constant 0 : i32
    %c0_i32_1 = arith.constant 0 : i32
    return %3, %c0_i32, %c0_i32_0 : i32, i32, i32
  }
  func.func @transform_6(%arg0: i32, %arg1: memref<16xi32, #tpu.memory_space<smem>>) -> (i32, i32, i32) {
    %c8_i32 = arith.constant 8 : i32
    %0 = arith.muli %arg0, %c8_i32 : i32
    %c6_i32 = arith.constant 6 : i32
    %1 = arith.addi %0, %c6_i32 : i32
    %2 = arith.index_cast %1 : i32 to index
    %3 = memref.load %arg1[%2] : memref<16xi32, #tpu.memory_space<smem>>
    %c0_i32 = arith.constant 0 : i32
    %c0_i32_0 = arith.constant 0 : i32
    %c0_i32_1 = arith.constant 0 : i32
    return %3, %c0_i32, %c0_i32_0 : i32, i32, i32
  }
  func.func @transform_7(%arg0: i32, %arg1: memref<16xi32, #tpu.memory_space<smem>>) -> (i32, i32, i32) {
    %c8_i32 = arith.constant 8 : i32
    %0 = arith.muli %arg0, %c8_i32 : i32
    %c7_i32 = arith.constant 7 : i32
    %1 = arith.addi %0, %c7_i32 : i32
    %2 = arith.index_cast %1 : i32 to index
    %3 = memref.load %arg1[%2] : memref<16xi32, #tpu.memory_space<smem>>
    %c0_i32 = arith.constant 0 : i32
    %c0_i32_0 = arith.constant 0 : i32
    %c0_i32_1 = arith.constant 0 : i32
    return %3, %c0_i32, %c0_i32_0 : i32, i32, i32
  }
  func.func @transform_8(%arg0: i32, %arg1: memref<16xi32, #tpu.memory_space<smem>>) -> (i32, i32) {
    %c0_i32 = arith.constant 0 : i32
    %c0_i32_0 = arith.constant 0 : i32
    return %arg0, %c0_i32 : i32, i32
  }
}

</mosaic_0001>

<bundles_post_ra>
// kernel: tpu_custom_call.1
= control target key start
LH: loop header
LB: loop body
LE: loop exit
PB: predicated region body
PF: predicated region fallthrough
CT: control target
= control target key end

     0   :  { %s2619_s0 = inlined_call_operand.hbm [shape: s32[16], index: 0, kind: input, shape index: {}]   ;;  %s2620_s1 = inlined_call_operand.hbm [shape: f32[30,1,128], index: 1, kind: input, shape index: {}]   ;;  %s2621_s2 = inlined_call_operand.hbm [shape: f32[30,1,128], index: 2, kind: input, shape index: {}]   ;;  %s2622_s3 = inlined_call_operand.hbm [shape: f32[30,1,128], index: 3, kind: input, shape index: {}]   ;;  %s2623_s4 = inlined_call_operand.hbm [shape: f32[30,1,128], index: 4, kind: input, shape index: {}]   ;;  %s2624_s5 = inlined_call_operand.hbm [shape: f32[30,1,128], index: 5, kind: input, shape index: {}]   ;;  %s2625_s6 = inlined_call_operand.hbm [shape: f32[30,1,128], index: 6, kind: input, shape index: {}]   ;;  %s2626_s7 = inlined_call_operand.hbm [shape: f32[30,1,128], index: 7, kind: input, shape index: {}]   ;;  %s2627_s8 = inlined_call_operand.vmem [shape: f32[30,1,128], index: 8, kind: input, shape index: {}]   ;;  %s2628_s9 = inlined_call_operand.hbm [shape: f32[16,128], index: 9, kind: output, shape index: {}]  }
   0x1   :  { %2676 = sst [smem:[#allocation67_spill]] %s2620_s1  ;;  %s1179_s11 = scalar_lea.hbm %s2619_s0, 16 }
   0x2   :  { %2677 = sst [smem:[#allocation68_spill]] %s2621_s2  ;;  %p1180_p0 = scmp.ne.s32.totalorder %s2619_s0, %s1179_s11 }
   0x3   :  { %2678 = sst [smem:[#allocation69_spill]] %s2622_s3  ;;  %p1183_p1 = scmp.lt.u32.totalorder %s1179_s11, %s2619_s0 }
   0x4   :  { %2679 = sst [smem:[#allocation70_spill]] %s2623_s4 }
   0x5   :  { %2680 = sst [smem:[#allocation71_spill]] %s2624_s5  ;;  %p1185_p2 = pnand %p1183_p1, %p1180_p0 }
   0x6   :  { %2681 = sst [smem:[#allocation72_spill]] %s2625_s6 }
   0x7   :  { %2682 = sst [smem:[#allocation73_spill]] %s2626_s7 }
   0x8   :  { %2683 = sst [smem:[#allocation74_spill]] %s2627_s8 }
   0x9   :  { %2684 = sst [smem:[#allocation75_spill]] %s2628_s9 }
   0xa   :  { %1188 = shalt.err (!%p1185_p2)  }
   0xb   :  { %s1661_s16 = smov [#allocation3]  }
   0xc   :  { %15 = dma.hbm_to_smem %s2619_s0, 16, %s1661_s16, [#allocation2] }
   0xd   :  { %1527 = dma.done.wait [#allocation2], 16 }
   0xe   :  { %1528 = vsyncadd [#allocation2], 4294967280 }
   0xf   :  { %17 = sfence }
  0x10   :  { %18 = vsyncpa [#allocation5], 0 }
  0x11   :  { %20 = vsyncpa [#allocation5 + $0x1], 0 }
  0x12   :  { %21 = vsyncpa [#allocation8], 0 }
  0x13   :  { %23 = vsyncpa [#allocation8 + $0x1], 0 }
  0x14   :  { %24 = vsyncpa [#allocation11], 0 }
  0x15   :  { %26 = vsyncpa [#allocation11 + $0x1], 0 }
  0x16   :  { %27 = vsyncpa [#allocation14], 0 }
  0x17   :  { %29 = vsyncpa [#allocation14 + $0x1], 0 }
  0x18   :  { %30 = vsyncpa [#allocation6], 0 }
  0x19   :  { %32 = vsyncpa [#allocation6 + $0x1], 0  ;;  %s1732_s19 = smov 0   ;;  %s1734_s20 = smov 0  }
  0x1a   :  { %s1736_s21 = smov 0   ;;  %s1738_s0 = smov 0  }
  0x1b   :  { %s1740_s22 = smov 0   ;;  %s1742_s23 = smov 0  }
  0x1c   :  { %s1744_s24 = smov 0   ;;  %s1746_s25 = smov 0  }
  0x1d   :  { %s1748_s26 = smov 0   ;;  %s1750_s27 = smov 0  }
  0x1e   :  { %s1752_s28 = smov 0   ;;  %s1754_s29 = smov 0  }
  0x1f   :  { %s1756_s30 = smov 0   ;;  %s1758_s10 = smov 0  }
  0x20   :  { %s1760_s11 = smov 0   ;;  %s1762_s12 = smov 0  }
  0x21   :  { %s1764_s13 = smov 0   ;;  %s1766_s14 = smov 0  }
  0x22   :  { %s1768_s15 = smov 0   ;;  %s1770_s16 = smov 0  }
  0x23   :  { %s1772_s17 = smov 0   ;;  %s1774_s18 = smov 0  }
  0x24   :  { %s1776_s8 = smov 0   ;;  %s1778_s9 = smov 0  }
  0x25   :  { %s1780_s7 = smov 0  }
  0x26   :  { %2685 = sst [smem:[#allocation40_spill]] %s1780_s7 }
  0x27 LB: > { %2687 = sst [smem:[#allocation41_spill]] %s1563_s19  ;;  %s2693_s7 = sld [smem:[#allocation40_spill]]  ;;  %s1655_s9 = sphi %s1778_s9, %s2851_s9   ;;  %s1651_s8 = sphi %s1776_s8, %s2860_s8   ;;  %s1647_s18 = sphi %s1774_s18, %s2859_s18   ;;  %s1643_s17 = sphi %s1772_s17, %s2858_s17   ;;  %s1639_s16 = sphi %s1770_s16, %s2857_s16   ;;  %s1635_s15 = sphi %s1768_s15, %s2856_s15   ;;  %s1631_s14 = sphi %s1766_s14, %s2855_s14   ;;  %s1627_s13 = sphi %s1764_s13, %s2854_s13   ;;  %s1623_s12 = sphi %s1762_s12, %s2839_s12   ;;  %s1619_s11 = sphi %s1760_s11, %s2838_s11   ;;  %s1615_s10 = sphi %s1758_s10, %s2853_s10   ;;  %s1611_s30 = sphi %s1756_s30, %s2852_s30   ;;  %s1607_s29 = sphi %s1754_s29, %s2836_s29   ;;  %s1603_s28 = sphi %s1752_s28, %s2835_s28   ;;  %s1599_s27 = sphi %s1750_s27, %s2834_s27   ;;  %s1595_s26 = sphi %s1748_s26, %s2833_s26   ;;  %s1591_s25 = sphi %s1746_s25, %s2850_s25   ;;  %s1587_s24 = sphi %s1744_s24, %s2848_s24   ;;  %s1583_s23 = sphi %s1742_s23, %s2847_s23   ;;  %s1579_s22 = sphi %s1740_s22, %s2845_s22   ;;  %s1575_s0 = sphi %s1738_s0, %s2830_s0   ;;  %s1571_s21 = sphi %s1736_s21, %s2829_s21   ;;  %s1567_s20 = sphi %s1734_s20, %s2842_s20   ;;  %s1563_s19 = sphi %s1732_s19, %s2840_s19  }
  0x28   : > { %2688 = sst [smem:[#allocation42_spill]] %s1571_s21  ;;  %p88_p5 = scmp.ne.s32.totalorder %s1643_s17, %s1639_s16 }
  0x29   : > { %2689 = sst [smem:[#allocation43_spill]] %s1575_s0  ;;  %p94_p6 = scmp.ne.s32.totalorder %s1639_s16, %s1635_s15 }
  0x2a   : > { %2690 = sst [smem:[#allocation44_spill]] %s1579_s22  ;;  %p309_p10 = scmp.ne.s32.totalorder %s1571_s21, %s1567_s20 }
  0x2b   : > { %2691 = sst [smem:[#allocation45_spill]] %s1583_s23  ;;  %p315_p12 = scmp.ne.s32.totalorder %s1567_s20, %s1563_s19 }
  0x2c   : > { %2692 = sst [smem:[#allocation46_spill]] %s1595_s26  ;;  %s2718_s2 = sld [smem:[#allocation68_spill]] }
  0x2d   : > { %2694 = sst [smem:[#allocation40_spill]] %s1599_s27  ;;  %s1856_s0 = sadd.s32 4294967295, %s2693_s7  }
  0x2e   : > { %2695 = sst [smem:[#allocation47_spill]] %s1603_s28  ;;  %s850_s5 = sadd.s32 4294967294, %s2693_s7  }
  0x2f   : > { %2696 = sst [smem:[#allocation48_spill]] %s1607_s29  ;;  %s1860_s23 = sadd.s32 1, %s2693_s7  }
  0x30   : > { %2697 = sst [smem:[#allocation49_spill]] %s1619_s11  ;;  %s2706_s3 = smov %s1860_s23 }
  0x31   : > { %2698 = sst [smem:[#allocation50_spill]] %s1623_s12  ;;  %s1863_s22 = sshll.u32 %s2693_s7, 3 }
  0x32   : > { %2699 = sst [smem:[#allocation51_spill]] %s1627_s13  ;;  %s1866_s27 = sadd.s32 8, %s1863_s22 }
  0x33   : > { %2700 = sst [smem:[#allocation52_spill]] %s1631_s14  ;;  %p2653_p3 = scmp.eq.s32.totalorder %s2693_s7, 0 }
  0x34   : > { %2701 = sst [smem:[#allocation53_spill]] %s1643_s17  ;;  %p2652_p4 = scmp.eq.s32.totalorder %s1856_s0, 0 }
  0x35   : > { %2702 = sst [smem:[#allocation54_spill]] %s1647_s18  ;;  %s73_s29 = sadd.s32 1, %s1863_s22 }
  0x36   : > { %2703 = sst [smem:[#allocation55_spill]] %s1655_s9  ;;  %s76_s12 = sadd.s32 1, %s1866_s27 }
  0x37   : > { %2704 = sst [smem:[#allocation56_spill]] %s2693_s7  ;;  %s296_s14 = ssub.s32 %s2693_s7, %s2706_s3 }
  0x38   : > { %2705 = sst [smem:[#allocation57_spill]] %s1860_s23  ;;  %s81_s23 = sadd.s32 1, %s1643_s17 }
  0x39   : > { %s74_s28 = sld [smem:[#allocation3 + %s73_s29]]  ;;  %s299_s13 = sadd.s32 1, %s1571_s21 }
  0x3a   : > { %s77_s1 = sld [smem:[#allocation3 + %s76_s12]]  ;;  %p1881_p7 = por %p88_p5, %p2653_p3 }
  0x3b   : > { %p1887_p8 = por %p94_p6, %p2652_p4  ;;  %p297_p9 = scmp.eq.s32.totalorder %s296_s14, 0 }
  0x3c   : > { %p310_p11 = scmp.eq.s32.totalorder %s1856_s0, 1  ;;  %p316_p13 = scmp.eq.s32.totalorder %s850_s5, 1 }
  0x3d   : > { %s2708_s18 = scalar_select %p1887_p8, 1, 0 }
  0x3e   : > { %p1896_p1 = por %p310_p11, %p309_p10  ;;  %p1906_p2 = por %p316_p13, %p315_p12 }
  0x3f   : > { %2709 = sst [smem:[#allocation58_spill]] %s2708_s18  ;;  %p2651_p6 = scmp.lt.s32.totalorder %s2693_s7, 2 }
  0x40   : > { %s78_s12 = ssub.s32 %s74_s28, %s77_s1  ;;  %s1913_s1 = sand.u32 1, %s2693_s7  }
  0x41   : > { %p79_p0 = scmp.eq.s32.totalorder %s78_s12, 0  ;;  %s357_s5 = sand.u32 1, %s1643_s17  }
  0x42   : > { %s2710_s15 = scalar_select %p1896_p1, 1, 0 }
  0x43   : > { %s1901_s3 = scalar_select %p297_p9, %s1571_s21, %s299_s13  }
  0x44   : > { %2711 = sst [smem:[#allocation59_spill]] %s2710_s15  ;;  %p1920_p10 = pnand %p2651_p6, %p1881_p7 }
  0x45   : > { %2712 = sst [smem:[#allocation60_spill]] %s1901_s3  ;;  %s2863_s29 = smov (!%p1881_p7, %s73_s29), 0 }
  0x46   : > { %s1904_s18 = scalar_select %p79_p0, %s1643_s17, %s81_s23  }
  0x47   : > { %s2714_s14 = scalar_select %p1906_p2, 1, 0 }
  0x48   : > { %2713 = sst [smem:[#allocation61_spill]] %s1904_s18  ;;  %s2867_s29 = smov (!%p2651_p6, %s2863_s29), 0 }
  0x49   : > { %2715 = sst [smem:[#allocation62_spill]] %s2714_s14  ;;  %s358_s23 = scalar_lea.vmem [#allocation7], %s357_s5 }
  0x4a   : > { %s909_s13 = scalar_select %p1881_p7, [#allocation3], [#allocation18] }
  0x4b   : > { %s368_s12 = sshll.u32 %s358_s23, 4  ;;  %p883_p9 = scmp.ge.s32.totalorder %s2693_s7, 1  ;;  %s1932_s12 = int_to_ptr.vmem [resolvable:$true] %s368_s12 }
  0x4c   : > { %s2865_s13 = smov (!%p2651_p6, %s909_s13), [#allocation25]  ;;  %p485_p11 = scmp.lt.s32.totalorder %s2693_s7, 3 }
  0x4d   : > { %s361_s18 = sld [smem:[%s2865_s13 + %s2867_s29]]  ;;  %s2650_s6 = sadd.s32 3, %s1863_s22 }
  0x4e   : > { %p1936_p12 = pnand %p883_p9, %p485_p11  ;;  %s1943_s21 = sld [smem:[#allocation3 + %s2650_s6]] }
  0x4f   : > { %s2656_s13 = scalar_lea.sflag [#allocation8], %s1913_s1  ;;  %p1191_p13 = pneg %p1920_p10 }
  0x50   : > { %s2717_s17 = scalar_select %p1936_p12, 1, 0 }
  0x51   : > { %s1194_s19 = scalar_lea.hbm %s2718_s2, 480 }
  0x53   : > { %s872_s3 = sshll.u32 %s361_s18, 4 }
  0x54   : > { %s1948_s5 = scalar_lea.hbm %s2718_s2, %s872_s3 }
  0x55   : > { %s1189_s23 = scalar_lea.hbm %s1948_s5, 16  ;;  %p1195_p11 = scmp.lt.u32.totalorder %s1948_s5, %s2718_s2 }
  0x56   : > { %p1190_p7 = scmp.ne.s32.totalorder %s1948_s5, %s1189_s23  ;;  %p1196_p5 = scmp.lt.u32.totalorder %s1194_s19, %s1189_s23 }
  0x57   : > { %p1198_p4 = scmp.lt.u32.totalorder %s1189_s23, %s1948_s5 }
  0x58   : > { %p1192_p0 = pnand %p1191_p13, %p1190_p7  ;;  %p1197_p6 = por %p1196_p5, %p1195_p11 }
  0x5a   : > { %p1193_p9 = pneg %p1192_p0  ;;  %p1199_p3 = por %p1198_p4, %p1197_p6 }
  0x5c   : > { %p1200_p2 = pnand %p1199_p3, %p1193_p9 }
  0x5e   : > { %1203 = shalt.err (!%p1200_p2)
}
  0x5f   : > { %s1204_s29 = scalar_lea.vmem %s1932_s12, 16  ;;  %s1662_s6 = smov [#allocation7]  }
  0x60   : > { %p1205_p7 = scmp.ne.s32.totalorder %s1932_s12, %s1204_s29  ;;  %s1209_s18 = sshll.u32 %s1662_s6, 4  ;;  %s1210_s18 = int_to_ptr.vmem [resolvable:$false] %s1209_s18 }
  0x61   : > { %s1211_s3 = scalar_lea.vmem %s1210_s18, 32  ;;  %p1212_p8 = scmp.lt.s32.totalorder %s1932_s12, %s1210_s18 }
  0x62   : > { %p1207_p0 = pnand %p1205_p7, %p1191_p13  ;;  %p1213_p5 = scmp.lt.s32.totalorder %s1211_s3, %s1204_s29 }
  0x64   : > { %p1208_p1 = pneg %p1207_p0  ;;  %p1214_p11 = por %p1213_p5, %p1212_p8 }
  0x66   : > { %p1215_p4 = pnand %p1214_p11, %p1208_p1 }
  0x68   : > { %1218 = shalt.err (!%p1215_p4)
}
  0x69   : > { %946 = dma.hbm_to_vmem [thread:$0]  (!%p1920_p10), %s1948_s5, 16, %s1932_s12, %s2656_s13  }
  0x6a   : > { %s2719_s29 = sadd.s32 3, %s1866_s27  ;;  %p152_p3 = scmp.ne.s32.totalorder %s1619_s11, %s1615_s10 }
  0x6b   : > { %s141_s28 = sld [smem:[#allocation3 + %s2719_s29]]  ;;  %p158_p8 = scmp.ne.s32.totalorder %s1615_s10, %s1611_s30 }
  0x6c   : > { %s145_s23 = sadd.s32 1, %s1619_s11  ;;  %s397_s19 = sand.u32 1, %s1619_s11  }
  0x6d   : > { %p2720_p1 = scmp.eq.s32.totalorder %s2693_s7, 0  ;;  %p2721_p6 = scmp.eq.s32.totalorder %s1856_s0, 0 }
  0x6e   : > { %s398_s30 = scalar_lea.vmem [#allocation10], %s397_s19  ;;  %s2723_s18 = sadd.s32 3, %s1863_s22 }
  0x6f   : > { %p154_p2 = por %p152_p3, %p2720_p1  ;;  %p1991_p13 = por %p158_p8, %p2721_p6 }
  0x70   : > { %s408_s5 = sshll.u32 %s398_s30, 4  ;;  %p2725_p9 = scmp.lt.s32.totalorder %s2693_s7, 2  ;;  %s2019_s5 = int_to_ptr.vmem [resolvable:$true] %s408_s5 }
  0x71   : > { %s2722_s14 = scalar_select %p1991_p13, 1, 0 }
  0x72   : > { %s915_s6 = scalar_select %p154_p2, [#allocation3], [#allocation20] }
  0x73   : > { %s142_s12 = ssub.s32 %s1943_s21, %s141_s28  ;;  %s2869_s18 = smov (!%p154_p2, %s2723_s18), 0 }
  0x74   : > { %p143_p10 = scmp.eq.s32.totalorder %s142_s12, 0  ;;  %s2871_s6 = smov (!%p2725_p9, %s915_s6), [#allocation27] }
  0x75   : > { %p2726_p7 = pmov %p2725_p9  ;;  %s2657_s28 = sadd.s32 5, %s1863_s22 }
  0x76   : > { %s1999_s3 = scalar_select %p143_p10, %s1619_s11, %s145_s23  }
  0x77   : > { %s2873_s18 = smov (!%p2726_p7, %s2869_s18), 0  ;;  %p2727_p0 = pmov %p2726_p7 }
  0x78   : > { %2724 = sst [smem:[#allocation63_spill]] %s1999_s3  ;;  %s204_s19 = sadd.s32 5, %s1866_s27 }
  0x79   : > { %p2007_p5 = pnand %p2727_p0, %p154_p2  ;;  %s401_s21 = sld [smem:[%s2871_s6 + %s2873_s18]] }
  0x7a   : > { %s2015_s12 = sld [smem:[#allocation3 + %s2657_s28]]  ;;  %p216_p11 = scmp.ne.s32.totalorder %s1595_s26, %s1591_s25 }
  0x7b   : > { %s2017_s30 = sld [smem:[#allocation3 + %s204_s19]]  ;;  %p2730_p3 = pmov %p2720_p1 }
  0x7c   : > { %s2729_s4 = sld [smem:[#allocation70_spill]]  ;;  %p1221_p2 = pneg %p2007_p5 }
  0x7d   : > { %p2032_p8 = por %p216_p11, %p2730_p3 }
  0x7f   : > { %s876_s23 = sshll.u32 %s401_s21, 4 }
  0x82   : > { %s2028_s3 = scalar_lea.hbm %s2729_s4, %s876_s23  ;;  %s1224_s21 = scalar_lea.hbm %s2729_s4, 480 }
  0x83   : > { %s1219_s19 = scalar_lea.hbm %s2028_s3, 16  ;;  %p1225_p9 = scmp.lt.u32.totalorder %s2028_s3, %s2729_s4 }
  0x84   : > { %p1220_p1 = scmp.ne.s32.totalorder %s2028_s3, %s1219_s19  ;;  %p1226_p7 = scmp.lt.u32.totalorder %s1224_s21, %s1219_s19 }
  0x85   : > { %p1228_p11 = scmp.lt.u32.totalorder %s1219_s19, %s2028_s3 }
  0x86   : > { %p1222_p6 = pnand %p1221_p2, %p1220_p1  ;;  %p1227_p0 = por %p1226_p7, %p1225_p9 }
  0x88   : > { %p1223_p10 = pneg %p1222_p6  ;;  %p1229_p3 = por %p1228_p11, %p1227_p0 }
  0x8a   : > { %p1230_p4 = pnand %p1229_p3, %p1223_p10 }
  0x8c   : > { %1233 = shalt.err (!%p1230_p4)
}
  0x8d   : > { %s1234_s18 = scalar_lea.vmem %s2019_s5, 16  ;;  %s1663_s2 = smov [#allocation10]  }
  0x8e   : > { %p1235_p1 = scmp.ne.s32.totalorder %s2019_s5, %s1234_s18  ;;  %s1239_s13 = sshll.u32 %s1663_s2, 4  ;;  %s1240_s13 = int_to_ptr.vmem [resolvable:$false] %s1239_s13 }
  0x8f   : > { %s1241_s28 = scalar_lea.vmem %s1240_s13, 32  ;;  %p1242_p12 = scmp.lt.s32.totalorder %s2019_s5, %s1240_s13 }
  0x90   : > { %p1237_p6 = pnand %p1235_p1, %p1221_p2  ;;  %p1243_p9 = scmp.lt.s32.totalorder %s1241_s28, %s1234_s18 }
  0x92   : > { %p1238_p13 = pneg %p1237_p6  ;;  %p1244_p7 = por %p1243_p9, %p1242_p12 }
  0x94   : > { %p1245_p0 = pnand %p1244_p7, %p1238_p13 }
  0x96   : > { %1248 = shalt.err (!%p1245_p0)
}
  0x97   : > { %s2732_s19 = scalar_lea.sflag [#allocation11], %s1913_s1  ;;  %s209_s29 = sadd.s32 1, %s1595_s26 }
  0x98   : > { %956 = dma.hbm_to_vmem [thread:$0]  (!%p2007_p5), %s2028_s3, 16, %s2019_s5, %s2732_s19  }
  0x99   : > { %p2733_p12 = scmp.eq.s32.totalorder %s1856_s0, 0  ;;  %p2734_p13 = scmp.ne.s32.totalorder %s1591_s25, %s1587_s24 }
  0x9a   : > { %s206_s21 = ssub.s32 %s2015_s12, %s2017_s30  ;;  %s437_s23 = sand.u32 1, %s1595_s26  }
  0x9b   : > { %p2070_p4 = por %p2734_p13, %p2733_p12  ;;  %p207_p2 = scmp.eq.s32.totalorder %s206_s21, 0 }
  0x9c   : > { %s2736_s2 = sld [smem:[#allocation54_spill]]  ;;  %s2738_s5 = sadd.s32 5, %s1863_s22 }
  0x9d   : > { %s2735_s18 = scalar_select %p2070_p4, 1, 0 }
  0x9e   : > { %s921_s13 = scalar_select %p2032_p8, [#allocation3], [#allocation22] }
  0x9f   : > { %s2080_s28 = scalar_select %p207_p2, %s1595_s26, %s209_s29  }
  0xa0   : > { %s2875_s5 = smov (!%p2032_p8, %s2738_s5), 0  ;;  %p2739_p5 = scmp.lt.s32.totalorder %s2693_s7, 2 }
  0xa1   : > { %2737 = sst [smem:[#allocation64_spill]] %s2080_s28  ;;  %s438_s12 = scalar_lea.vmem [#allocation13], %s437_s23 }
  0xa2   : > { %s2877_s13 = smov (!%p2739_p5, %s921_s13), [#allocation29]  ;;  %p2740_p10 = pmov %p2739_p5 }
  0xa3   : > { %p2741_p11 = pmov %p2739_p5  ;;  %s448_s30 = sshll.u32 %s438_s12, 4  ;;  %s2101_s30 = int_to_ptr.vmem [resolvable:$true] %s448_s30 }
  0xa4   : > { %s2879_s5 = smov (!%p2740_p10, %s2875_s5), 0  ;;  %s2099_s19 = sld [smem:[#allocation3 + %s1863_s22]] }
  0xa5   : > { %p2094_p3 = pnand %p2741_p11, %p2032_p8  ;;  %s441_s3 = sld [smem:[%s2877_s13 + %s2879_s5]] }
  0xa6   : > { %s2104_s29 = sld [smem:[#allocation3 + %s1866_s27]]  ;;  %s2662_s23 = scalar_lea.sflag [#allocation14], %s1913_s1 }
  0xa7   : > { %s2743_s11 = sld [smem:[#allocation72_spill]]  ;;  %p1251_p9 = pneg %p2094_p3 }
  0xab   : > { %s880_s21 = sshll.u32 %s441_s3, 4 }
  0xad   : > { %s2744_s7 = smov %s2743_s11  ;;  %s2111_s28 = scalar_lea.hbm %s2743_s11, %s880_s21 }
  0xae   : > { %s1249_s13 = scalar_lea.hbm %s2111_s28, 16  ;;  %s1254_s4 = scalar_lea.hbm %s2744_s7, 480 }
  0xaf   : > { %p1250_p6 = scmp.ne.s32.totalorder %s2111_s28, %s1249_s13  ;;  %p1255_p12 = scmp.lt.u32.totalorder %s2111_s28, %s2744_s7 }
  0xb0   : > { %p1256_p13 = scmp.lt.u32.totalorder %s1254_s4, %s1249_s13  ;;  %p1258_p5 = scmp.lt.u32.totalorder %s1249_s13, %s2111_s28 }
  0xb1   : > { %p1252_p7 = pnand %p1251_p9, %p1250_p6 }
  0xb2   : > { %p1257_p2 = por %p1256_p13, %p1255_p12 }
  0xb3   : > { %p1253_p0 = pneg %p1252_p7 }
  0xb4   : > { %p1259_p10 = por %p1258_p5, %p1257_p2 }
  0xb6   : > { %p1260_p11 = pnand %p1259_p10, %p1253_p0 }
  0xb8   : > { %1263 = shalt.err (!%p1260_p11)
}
  0xb9   : > { %s1264_s21 = scalar_lea.vmem %s2101_s30, 16  ;;  %s1664_s6 = smov [#allocation13]  }
  0xba   : > { %p1265_p6 = scmp.ne.s32.totalorder %s2101_s30, %s1264_s21  ;;  %s1269_s5 = sshll.u32 %s1664_s6, 4  ;;  %s1270_s5 = int_to_ptr.vmem [resolvable:$false] %s1269_s5 }
  0xbb   : > { %s1271_s3 = scalar_lea.vmem %s1270_s5, 32  ;;  %p1272_p1 = scmp.lt.s32.totalorder %s2101_s30, %s1270_s5 }
  0xbc   : > { %p1267_p7 = pnand %p1265_p6, %p1251_p9  ;;  %p1273_p12 = scmp.lt.s32.totalorder %s1271_s3, %s1264_s21 }
  0xbe   : > { %p1268_p8 = pneg %p1267_p7  ;;  %p1274_p13 = por %p1273_p12, %p1272_p1 }
  0xc0   : > { %p1275_p2 = pnand %p1274_p13, %p1268_p8 }
  0xc2   : > { %1278 = shalt.err (!%p1275_p2)
}
  0xc3   : > { %s2745_s13 = sld [smem:[#allocation56_spill]]  ;;  %p2746_p1 = scmp.ne.s32.totalorder %s1655_s9, %s1651_s8 }
  0xc4   : > { %966 = dma.hbm_to_vmem [thread:$0]  (!%p2094_p3), %s2111_s28, 16, %s2101_s30, %s2662_s23  }
  0xc5   : > { %p2749_p0 = scmp.ne.s32.totalorder %s1651_s8, %s2736_s2  ;;  %p2750_p5 = scmp.eq.s32.totalorder %s1856_s0, 0 }
  0xc6   : > { %s49_s11 = sadd.s32 1, %s1655_s9  ;;  %s336_s28 = sand.u32 1, %s1655_s9  }
  0xc7   : > { %p2157_p10 = por %p2750_p5, %p2749_p0  ;;  %s46_s30 = ssub.s32 %s2099_s19, %s2104_s29 }
  0xc8   : > { %p47_p3 = scmp.eq.s32.totalorder %s46_s30, 0  ;;  %s2753_s21 = sld [smem:[#allocation51_spill]] }
  0xc9   : > { %p2747_p8 = scmp.eq.s32.totalorder %s2745_s13, 0  ;;  %s2754_s6 = sld [smem:[#allocation52_spill]] }
  0xca   : > { %s2751_s4 = scalar_select %p2157_p10, 1, 0 }
  0xcb   : > { %p2148_p9 = por %p2747_p8, %p2746_p1  ;;  %p2756_p11 = scmp.lt.s32.totalorder %s2745_s13, 2 }
  0xcc   : > { %2752 = sst [smem:[#allocation54_spill]] %s2751_s4  ;;  %s339_s3 = scalar_lea.vmem [#allocation4], %s336_s28 }
  0xcd   : > { %s906_s12 = scalar_select %p2148_p9, [#allocation3], [#allocation17] }
  0xce   : > { %s2168_s2 = scalar_select %p47_p3, %s1655_s9, %s49_s11  }
  0xcf   : > { %s907_s5 = scalar_select %p2148_p9, %s1863_s22, 0 }
  0xd0   : > { %2755 = sst [smem:[#allocation65_spill]] %s2168_s2  ;;  %s2881_s12 = smov (!%p2756_p11, %s906_s12), [#allocation24] }
  0xd1   : > { %p2757_p6 = pmov %p2756_p11  ;;  %s348_s23 = sshll.u32 %s339_s3, 4  ;;  %s2185_s23 = int_to_ptr.vmem [resolvable:$true] %s348_s23 }
  0xd2   : > { %s105_s29 = sadd.s32 2, %s1863_s22  ;;  %s108_s11 = sadd.s32 2, %s1866_s27 }
  0xd3   : > { %s2883_s5 = smov (!%p2757_p6, %s907_s5), 0  ;;  %p2758_p7 = pmov %p2757_p6 }
  0xd4   : > { %s341_s19 = sld [smem:[%s2881_s12 + %s2883_s5]]  ;;  %s337_s12 = scalar_lea.sflag [#allocation5], %s336_s28 }
  0xd5   : > { %p2181_p12 = pnand %p2758_p7, %p2148_p9  ;;  %s2191_s30 = sld [smem:[#allocation3 + %s105_s29]] }
  0xd6   : > { %s2193_s2 = sld [smem:[#allocation3 + %s108_s11]] }
  0xd7   : > { %s2760_s26 = sld [smem:[#allocation67_spill]]  ;;  %p1281_p1 = pneg %p2181_p12 }
  0xda   : > { %s870_s9 = sshll.u32 %s341_s19, 4 }
  0xdd   : > { %s2761_s4 = smov %s2760_s26  ;;  %s2198_s15 = scalar_lea.hbm %s2760_s26, %s870_s9 }
  0xde   : > { %s1279_s5 = scalar_lea.hbm %s2198_s15, 16  ;;  %s1284_s3 = scalar_lea.hbm %s2761_s4, 480 }
  0xdf   : > { %p1280_p2 = scmp.ne.s32.totalorder %s2198_s15, %s1279_s5  ;;  %p1285_p0 = scmp.lt.u32.totalorder %s2198_s15, %s2761_s4 }
  0xe0   : > { %p1286_p5 = scmp.lt.u32.totalorder %s1284_s3, %s1279_s5  ;;  %p1288_p11 = scmp.lt.u32.totalorder %s1279_s5, %s2198_s15 }
  0xe1   : > { %p1282_p8 = pnand %p1281_p1, %p1280_p2 }
  0xe2   : > { %p1287_p3 = por %p1286_p5, %p1285_p0 }
  0xe3   : > { %p1283_p9 = pneg %p1282_p8 }
  0xe4   : > { %p1289_p6 = por %p1288_p11, %p1287_p3 }
  0xe6   : > { %p1290_p7 = pnand %p1289_p6, %p1283_p9 }
  0xe8   : > { %1293 = shalt.err (!%p1290_p7)
}
  0xe9   : > { %s1294_s28 = scalar_lea.vmem %s2185_s23, 16  ;;  %s1665_s24 = smov [#allocation4]  }
  0xea   : > { %p1295_p2 = scmp.ne.s32.totalorder %s2185_s23, %s1294_s28  ;;  %s1299_s19 = sshll.u32 %s1665_s24, 4  ;;  %s1300_s19 = int_to_ptr.vmem [resolvable:$false] %s1299_s19 }
  0xeb   : > { %s1301_s11 = scalar_lea.vmem %s1300_s19, 32  ;;  %p1302_p4 = scmp.lt.s32.totalorder %s2185_s23, %s1300_s19 }
  0xec   : > { %p1297_p8 = pnand %p1295_p2, %p1281_p1  ;;  %p1303_p0 = scmp.lt.s32.totalorder %s1301_s11, %s1294_s28 }
  0xee   : > { %p1298_p13 = pneg %p1297_p8  ;;  %p1304_p5 = por %p1303_p0, %p1302_p4 }
  0xf0   : > { %p1305_p3 = pnand %p1304_p5, %p1298_p13 }
  0xf2   : > { %1308 = shalt.err (!%p1305_p3)
}
  0xf3   : > { %s2762_s5 = sld [smem:[#allocation50_spill]]  ;;  %p2763_p4 = scmp.eq.s32.totalorder %s2745_s13, 0 }
  0xf4   : > { %941 = dma.hbm_to_vmem [thread:$0]  (!%p2181_p12), %s2198_s15, 16, %s2185_s23, %s337_s12  }
  0xf5   : > { %p2764_p13 = scmp.ne.s32.totalorder %s2754_s6, %s2753_s21  ;;  %s113_s3 = sadd.s32 1, %s2754_s6 }
  0xf6   : > { %s377_s9 = sand.u32 1, %s2754_s6   ;;  %s110_s26 = ssub.s32 %s2191_s30, %s2193_s2 }
  0xf7   : > { %p2232_p1 = por %p2764_p13, %p2763_p4  ;;  %p2766_p11 = scmp.eq.s32.totalorder %s1856_s0, 0 }
  0xf8   : > { %p111_p12 = scmp.eq.s32.totalorder %s110_s26, 0  ;;  %s2768_s23 = sld [smem:[#allocation47_spill]] }
  0xf9   : > { %p126_p9 = scmp.ne.s32.totalorder %s2753_s21, %s2762_s5  ;;  %s2769_s12 = sld [smem:[#allocation48_spill]] }
  0xfa   : > { %s912_s15 = scalar_select %p2232_p1, [#allocation3], [#allocation19] }
  0xfb   : > { %p2244_p6 = por %p126_p9, %p2766_p11  ;;  %s2885_s6 = smov (!%p111_p12, %s2754_s6), %s113_s3 }
  0xfc   : > { %2770 = sst [smem:[#allocation66_spill]] %s2885_s6  ;;  %s2887_s29 = smov (!%p2232_p1, %s105_s29), 0 }
  0xfd   : > { %s2767_s28 = scalar_select %p2244_p6, 1, 0 }
  0xfe   : > { %p2771_p7 = scmp.lt.s32.totalorder %s2745_s13, 2  ;;  %s378_s21 = scalar_lea.vmem [#allocation9], %s377_s9 }
  0xff   : > { %s388_s2 = sshll.u32 %s378_s21, 4  ;;  %s169_s19 = sadd.s32 4, %s1863_s22  ;;  %s2269_s2 = int_to_ptr.vmem [resolvable:$true] %s388_s2 }
 0x100   : > { %s2889_s15 = smov (!%p2771_p7, %s912_s15), [#allocation26]  ;;  %p2772_p2 = pmov %p2771_p7 }
 0x101   : > { %s172_s11 = sadd.s32 4, %s1866_s27  ;;  %s2275_s5 = sld [smem:[#allocation3 + %s169_s19]] }
 0x102   : > { %s2891_s29 = smov (!%p2772_p2, %s2887_s29), 0  ;;  %p2773_p8 = pmov %p2772_p2 }
 0x103   : > { %s381_s24 = sld [smem:[%s2889_s15 + %s2891_s29]] }
 0x104   : > { %p2265_p0 = pnand %p2773_p8, %p2232_p1  ;;  %s2277_s3 = sld [smem:[#allocation3 + %s172_s11]] }
 0x105   : > { %s2775_s21 = sld [smem:[#allocation69_spill]] }
 0x106   : > { %p1311_p4 = pneg %p2265_p0 }
 0x109   : > { %s874_s9 = sshll.u32 %s381_s24, 4 }
 0x10b   : > { %s2776_s4 = smov %s2775_s21  ;;  %s2282_s6 = scalar_lea.hbm %s2775_s21, %s874_s9 }
 0x10c   : > { %s1309_s29 = scalar_lea.hbm %s2282_s6, 16  ;;  %s1314_s11 = scalar_lea.hbm %s2776_s4, 480 }
 0x10d   : > { %p1310_p3 = scmp.ne.s32.totalorder %s2282_s6, %s1309_s29  ;;  %p1315_p9 = scmp.lt.u32.totalorder %s2282_s6, %s2776_s4 }
 0x10e   : > { %p1316_p11 = scmp.lt.u32.totalorder %s1314_s11, %s1309_s29  ;;  %p1318_p7 = scmp.lt.u32.totalorder %s1309_s29, %s2282_s6 }
 0x10f   : > { %p1312_p13 = pnand %p1311_p4, %p1310_p3 }
 0x110   : > { %p1317_p12 = por %p1316_p11, %p1315_p9 }
 0x111   : > { %p1313_p1 = pneg %p1312_p13 }
 0x112   : > { %p1319_p2 = por %p1318_p7, %p1317_p12 }
 0x114   : > { %p1320_p8 = pnand %p1319_p2, %p1313_p1 }
 0x116   : > { %1323 = shalt.err (!%p1320_p8)
}
 0x117   : > { %s1324_s7 = scalar_lea.vmem %s2269_s2, 16  ;;  %s1666_s21 = smov [#allocation9]  }
 0x118   : > { %p1325_p3 = scmp.ne.s32.totalorder %s2269_s2, %s1324_s7  ;;  %s1329_s15 = sshll.u32 %s1666_s21, 4  ;;  %s1330_s15 = int_to_ptr.vmem [resolvable:$false] %s1329_s15 }
 0x119   : > { %s1331_s24 = scalar_lea.vmem %s1330_s15, 32  ;;  %p1332_p6 = scmp.lt.s32.totalorder %s2269_s2, %s1330_s15 }
 0x11a   : > { %p1327_p13 = pnand %p1325_p3, %p1311_p4  ;;  %p1333_p9 = scmp.lt.s32.totalorder %s1331_s24, %s1324_s7 }
 0x11c   : > { %p1328_p5 = pneg %p1327_p13  ;;  %p1334_p11 = por %p1333_p9, %p1332_p6 }
 0x11e   : > { %p1335_p12 = pnand %p1334_p11, %p1328_p5 }
 0x120   : > { %1338 = shalt.err (!%p1335_p12)
}
 0x121   : > { %s2777_s29 = scalar_lea.sflag [#allocation8], %s1913_s1  ;;  %s2778_s11 = sld [smem:[#allocation40_spill]] }
 0x122   : > { %951 = dma.hbm_to_vmem [thread:$0]  (!%p2265_p0), %s2282_s6, 16, %s2269_s2, %s2777_s29  }
 0x123   : > { %p2779_p6 = scmp.eq.s32.totalorder %s2745_s13, 0  ;;  %p2780_p5 = scmp.ne.s32.totalorder %s2769_s12, %s2768_s23 }
 0x124   : > { %s177_s26 = sadd.s32 1, %s2769_s12  ;;  %s417_s9 = sand.u32 1, %s2769_s12  }
 0x125   : > { %p2318_p4 = por %p2780_p5, %p2779_p6  ;;  %s174_s7 = ssub.s32 %s2275_s5, %s2277_s3 }
 0x126   : > { %p2782_p7 = scmp.eq.s32.totalorder %s1856_s0, 0  ;;  %p175_p0 = scmp.eq.s32.totalorder %s174_s7, 0 }
 0x127   : > { %p190_p1 = scmp.ne.s32.totalorder %s2768_s23, %s2778_s11  ;;  %s2784_s2 = sld [smem:[#allocation44_spill]] }
 0x128   : > { %s918_s6 = scalar_select %p2318_p4, [#allocation3], [#allocation21] }
 0x129   : > { %p2330_p2 = por %p190_p1, %p2782_p7  ;;  %s2785_s15 = sld [smem:[#allocation45_spill]] }
 0x12a   : > { %s2893_s12 = smov (!%p175_p0, %s2769_s12), %s177_s26  ;;  %s2895_s19 = smov (!%p2318_p4, %s169_s19), 0 }
 0x12b   : > { %s2783_s21 = scalar_select %p2330_p2, 1, 0 }
 0x12c   : > { %2786 = sst [smem:[#allocation40_spill]] %s2893_s12  ;;  %p2787_p8 = scmp.lt.s32.totalorder %s2745_s13, 2 }
 0x12d   : > { %s418_s23 = scalar_lea.vmem [#allocation12], %s417_s9  ;;  %s233_s29 = sadd.s32 6, %s1863_s22 }
 0x12e   : > { %s2897_s6 = smov (!%p2787_p8, %s918_s6), [#allocation28]  ;;  %p2788_p3 = pmov %p2787_p8 }
 0x12f   : > { %s428_s5 = sshll.u32 %s418_s23, 4  ;;  %s236_s11 = sadd.s32 6, %s1866_s27  ;;  %s2355_s5 = int_to_ptr.vmem [resolvable:$true] %s428_s5 }
 0x130   : > { %s2899_s19 = smov (!%p2788_p3, %s2895_s19), 0  ;;  %p2789_p13 = pmov %p2788_p3 }
 0x131   : > { %s421_s24 = sld [smem:[%s2897_s6 + %s2899_s19]] }
 0x132   : > { %p2351_p9 = pnand %p2789_p13, %p2318_p4  ;;  %s2361_s26 = sld [smem:[#allocation3 + %s233_s29]] }
 0x133   : > { %s2363_s7 = sld [smem:[#allocation3 + %s236_s11]] }
 0x134   : > { %s2791_s4 = sld [smem:[#allocation71_spill]]  ;;  %p1341_p6 = pneg %p2351_p9 }
 0x137   : > { %s878_s9 = sshll.u32 %s421_s24, 4 }
 0x13a   : > { %s2368_s12 = scalar_lea.hbm %s2791_s4, %s878_s9  ;;  %s1344_s24 = scalar_lea.hbm %s2791_s4, 480 }
 0x13b   : > { %s1339_s19 = scalar_lea.hbm %s2368_s12, 16  ;;  %p1345_p1 = scmp.lt.u32.totalorder %s2368_s12, %s2791_s4 }
 0x13c   : > { %p1340_p12 = scmp.ne.s32.totalorder %s2368_s12, %s1339_s19  ;;  %p1346_p7 = scmp.lt.u32.totalorder %s1344_s24, %s1339_s19 }
 0x13d   : > { %p1348_p8 = scmp.lt.u32.totalorder %s1339_s19, %s2368_s12 }
 0x13e   : > { %p1342_p5 = pnand %p1341_p6, %p1340_p12  ;;  %p1347_p0 = por %p1346_p7, %p1345_p1 }
 0x140   : > { %p1343_p4 = pneg %p1342_p5  ;;  %p1349_p3 = por %p1348_p8, %p1347_p0 }
 0x142   : > { %p1350_p13 = pnand %p1349_p3, %p1343_p4 }
 0x144   : > { %1353 = shalt.err (!%p1350_p13)
}
 0x145   : > { %s1354_s23 = scalar_lea.vmem %s2355_s5, 16  ;;  %s1667_s30 = smov [#allocation12]  }
 0x146   : > { %p1355_p12 = scmp.ne.s32.totalorder %s2355_s5, %s1354_s23  ;;  %s1359_s27 = sshll.u32 %s1667_s30, 4  ;;  %s1360_s27 = int_to_ptr.vmem [resolvable:$false] %s1359_s27 }
 0x147   : > { %s1361_s6 = scalar_lea.vmem %s1360_s27, 32  ;;  %p1362_p2 = scmp.lt.s32.totalorder %s2355_s5, %s1360_s27 }
 0x148   : > { %p1357_p5 = pnand %p1355_p12, %p1341_p6  ;;  %p1363_p1 = scmp.lt.s32.totalorder %s1361_s6, %s1354_s23 }
 0x14a   : > { %p1358_p11 = pneg %p1357_p5  ;;  %p1364_p7 = por %p1363_p1, %p1362_p2 }
 0x14c   : > { %p1365_p0 = pnand %p1364_p7, %p1358_p11 }
 0x14e   : > { %1368 = shalt.err (!%p1365_p0)
}
 0x14f   : > { %s2792_s19 = scalar_lea.sflag [#allocation11], %s1913_s1  ;;  %s2793_s24 = sld [smem:[#allocation43_spill]] }
 0x150   : > { %961 = dma.hbm_to_vmem [thread:$0]  (!%p2351_p9), %s2368_s12, 16, %s2355_s5, %s2792_s19  }
 0x151   : > { %p2794_p2 = scmp.eq.s32.totalorder %s2745_s13, 0  ;;  %p2795_p11 = scmp.ne.s32.totalorder %s2785_s15, %s2784_s2 }
 0x152   : > { %s241_s3 = sadd.s32 1, %s2785_s15  ;;  %s238_s11 = ssub.s32 %s2361_s26, %s2363_s7 }
 0x153   : > { %p250_p6 = por %p2795_p11, %p2794_p2  ;;  %p2796_p8 = scmp.eq.s32.totalorder %s1856_s0, 0 }
 0x154   : > { %p239_p13 = scmp.eq.s32.totalorder %s238_s11, 0  ;;  %s457_s23 = sand.u32 1, %s2785_s15  }
 0x155   : > { %p254_p4 = scmp.ne.s32.totalorder %s2784_s2, %s2793_s24  ;;  %s2903_s29 = smov (!%p250_p6, %s233_s29), 0 }
 0x156   : > { %s924_s30 = scalar_select %p250_p6, [#allocation3], [#allocation23] }
 0x157   : > { %p2411_p3 = por %p254_p4, %p2796_p8  ;;  %s2901_s15 = smov (!%p239_p13, %s2785_s15), %s241_s3 }
 0x158   : > { %p2798_p12 = scmp.lt.s32.totalorder %s2745_s13, 2  ;;  %s458_s5 = scalar_lea.vmem [#allocation15], %s457_s23 }
 0x159   : > { %s2797_s9 = scalar_select %p2411_p3, 1, 0 }
 0x15a   : > { %s2905_s30 = smov (!%p2798_p12, %s924_s30), [#allocation30]  ;;  %p2799_p9 = pmov %p2798_p12 }
 0x15b   : > { %s468_s26 = sshll.u32 %s458_s5, 4  ;;  %s2802_s6 = sld [smem:[#allocation73_spill]]  ;;  %s2431_s26 = int_to_ptr.vmem [resolvable:$true] %s468_s26 }
 0x15c   : > { %s2907_s29 = smov (!%p2799_p9, %s2903_s29), 0  ;;  %p2800_p5 = pmov %p2799_p9 }
 0x15d   : > { %s461_s2 = sld [smem:[%s2905_s30 + %s2907_s29]] }
 0x15e   : > { %p2427_p1 = pnand %p2800_p5, %p250_p6 }
 0x160   : > { %p1371_p0 = pneg %p2427_p1 }
 0x161   : > { %s1374_s29 = scalar_lea.hbm %s2802_s6, 480 }
 0x163   : > { %s882_s7 = sshll.u32 %s461_s2, 4 }
 0x164   : > { %s466_s19 = scalar_lea.hbm %s2802_s6, %s882_s7 }
 0x165   : > { %s1369_s24 = scalar_lea.hbm %s466_s19, 16  ;;  %p1375_p6 = scmp.lt.u32.totalorder %s466_s19, %s2802_s6 }
 0x166   : > { %p1370_p7 = scmp.ne.s32.totalorder %s466_s19, %s1369_s24  ;;  %p1376_p4 = scmp.lt.u32.totalorder %s1374_s29, %s1369_s24 }
 0x167   : > { %p1378_p13 = scmp.lt.u32.totalorder %s1369_s24, %s466_s19 }
 0x168   : > { %p1372_p2 = pnand %p1371_p0, %p1370_p7  ;;  %p1377_p8 = por %p1376_p4, %p1375_p6 }
 0x16a   : > { %p1373_p11 = pneg %p1372_p2  ;;  %p1379_p12 = por %p1378_p13, %p1377_p8 }
 0x16c   : > { %p1380_p9 = pnand %p1379_p12, %p1373_p11 }
 0x16e   : > { %1383 = shalt.err (!%p1380_p9)
}
 0x16f   : > { %s1384_s30 = scalar_lea.vmem %s2431_s26, 16  ;;  %s1668_s2 = smov [#allocation15]  }
 0x170   : > { %p1385_p5 = scmp.ne.s32.totalorder %s2431_s26, %s1384_s30  ;;  %s1389_s5 = sshll.u32 %s1668_s2, 4  ;;  %s1390_s5 = int_to_ptr.vmem [resolvable:$false] %s1389_s5 }
 0x171   : > { %s1391_s7 = scalar_lea.vmem %s1390_s5, 32  ;;  %p1392_p3 = scmp.lt.s32.totalorder %s2431_s26, %s1390_s5 }
 0x172   : > { %p1387_p7 = pnand %p1385_p5, %p1371_p0  ;;  %p1393_p6 = scmp.lt.s32.totalorder %s1391_s7, %s1384_s30 }
 0x174   : > { %p1388_p2 = pneg %p1387_p7  ;;  %p1394_p4 = por %p1393_p6, %p1392_p3 }
 0x176   : > { %p1395_p8 = pnand %p1394_p4, %p1388_p2 }
 0x178   : > { %1398 = shalt.err (!%p1395_p8)
}
 0x179   : > { %s2803_s27 = scalar_lea.sflag [#allocation14], %s1913_s1  ;;  %p2804_p11 = scmp.ne.s32.totalorder %s2717_s17, 0 }
 0x17a   : > { %971 = dma.hbm_to_vmem [thread:$0]  (!%p2427_p1), %s466_s19, 16, %s2431_s26, %s2803_s27  }
 0x17b   : > { %489 = sbr.rel (%p2804_p11) target bundleno = 464 (0x1d0), region = 52  ;;  %s491_s24 = sand.u32 (!%p2804_p11), 1, %s1651_s8  }
 0x17c   : > { %s492_s13 = scalar_lea.sflag (!%p2804_p11), [#allocation5], %s491_s24  ;;  %s2461_s3 = scalar_lea.vmem (!%p2804_p11), [#allocation4], %s491_s24 }
 0x182   : > { %1530 = dma.done.wait (%p2157_p10), %s492_s13, 16  }
 0x183   : > { %1532 = vsyncadd (%p2157_p10), %s492_s13, 4294967280  ;;  %s2806_s12 = sld [smem:[#allocation58_spill]]  ;;  %s499_s1 = sand.u32 1, %s1856_s0  }
 0x184   : > { %s501_s29 = sand.u32 1, %s1639_s16   ;;  %s500_s26 = scalar_lea.sflag [#allocation8], %s499_s1 }
 0x185   : > { %s2469_s19 = scalar_lea.vmem [#allocation7], %s501_s29 }
 0x189   : > { %p2807_p3 = scmp.ne.s32.totalorder %s2806_s12, 0 }
 0x18b   : > { %1534 = dma.done.wait (%p2807_p3), %s500_s26, 16  }
 0x18c   : > { %1536 = vsyncadd (%p2807_p3), %s500_s26, 4294967280  ;;  %s2808_s17 = sld [smem:[#allocation51_spill]]  ;;  %p2809_p1 = scmp.ne.s32.totalorder %s2767_s28, 0 }
 0x192   : > { %s509_s11 = sand.u32 1, %s2808_s17  }
 0x193   : > { %s510_s23 = scalar_lea.vmem [#allocation9], %s509_s11 }
 0x194   : > { %1538 = dma.done.wait (%p2809_p1), %s500_s26, 16  }
 0x195   : > { %1540 = vsyncadd (%p2809_p1), %s500_s26, 4294967280  ;;  %s517_s30 = sand.u32 1, %s1615_s10   ;;  %s516_s2 = scalar_lea.sflag [#allocation11], %s499_s1 }
 0x196   : > { %s518_s5 = scalar_lea.vmem [#allocation10], %s517_s30  ;;  %p2810_p10 = scmp.ne.s32.totalorder %s2722_s14, 0 }
 0x198   : > { %1542 = dma.done.wait (%p2810_p10), %s516_s2, 16  }
 0x199   : > { %1544 = vsyncadd (%p2810_p10), %s516_s2, 4294967280  ;;  %s2811_s7 = sld [smem:[#allocation47_spill]]  ;;  %p2812_p0 = scmp.ne.s32.totalorder %s2783_s21, 0 }
 0x19f   : > { %s525_s27 = sand.u32 1, %s2811_s7  }
 0x1a0   : > { %s526_s22 = scalar_lea.vmem [#allocation12], %s525_s27 }
 0x1a1   : > { %1546 = dma.done.wait (%p2812_p0), %s516_s2, 16  }
 0x1a2   : > { %1548 = vsyncadd (%p2812_p0), %s516_s2, 4294967280  ;;  %s533_s28 = sand.u32 1, %s1591_s25   ;;  %s532_s24 = scalar_lea.sflag [#allocation14], %s499_s1 }
 0x1a3   : > { %s534_s13 = scalar_lea.vmem [#allocation13], %s533_s28  ;;  %p2813_p13 = scmp.ne.s32.totalorder %s2735_s18, 0 }
 0x1a5   : > { %1550 = dma.done.wait (%p2813_p13), %s532_s24, 16  }
 0x1a6   : > { %1552 = vsyncadd (%p2813_p13), %s532_s24, 4294967280  ;;  %s2814_s14 = sld [smem:[#allocation44_spill]]  ;;  %p2815_p12 = scmp.ne.s32.totalorder %s2797_s9, 0 }
 0x1ac   : > { %s541_s12 = sand.u32 1, %s2814_s14  }
 0x1ad   : > { %s542_s29 = scalar_lea.vmem [#allocation15], %s541_s12 }
 0x1ae   : > { %1554 = dma.done.wait (%p2815_p12), %s532_s24, 16  }
 0x1af   : > { %1556 = vsyncadd (%p2815_p12), %s532_s24, 4294967280  ;;  %s601_s21 = sand.u32 1, %s1567_s20   ;;  %s885_s1 = sshll.u32 %s1856_s0, 3  ;;  %v633_v0 = vld [vmem:[%s2461_s3] sm:$0x1] }
 0x1b0   : > { %s884_s26 = sshll.u32 %s601_s21, 3  ;;  %s625_s17 = sadd.s32 7, %s885_s1  ;;  %v635_v1 = vld [vmem:[%s2469_s19] sm:$0x1] }
 0x1b1   : > { %s626_s11 = sld [smem:[#allocation3 + %s625_s17]]  ;;  %v637_v2 = vld [vmem:[%s510_s23] sm:$0x1]  ;;  %s603_s18 = scalar_lea.vmem [#allocation16], %s884_s26 }
 0x1b2   : > { %634 = vst [vmem:[%s603_s18] sm:$0x1] %v633_v0  ;;  %636 = vst [vmem:[%s603_s18 + $0x1] sm:$0x1] %v635_v1  ;;  %v639_v3 = vld [vmem:[%s518_s5] sm:$0x1]  ;;  %s2816_s9 = sld [smem:[#allocation59_spill]] }
 0x1b3   : > { %638 = vst [vmem:[%s603_s18 + $0x2] sm:$0x1] %v637_v2  ;;  %v641_v4 = vld [vmem:[%s526_s22] sm:$0x1]  ;;  %640 = vst [vmem:[%s603_s18 + $0x3] sm:$0x1] %v639_v3 }
 0x1b4   : > { %v643_v5 = vld [vmem:[%s534_s13] sm:$0x1]  ;;  %642 = vst [vmem:[%s603_s18 + $0x4] sm:$0x1] %v641_v4  ;;  %s887_s30 = sshll.u32 %s1856_s0, 7  ;;  %s663_s2 = sshll.u32 %s603_s18, 4  ;;  %s2513_s2 = int_to_ptr.vmem [resolvable:$true] %s663_s2 }
 0x1b5   : > { %644 = vst [vmem:[%s603_s18 + $0x5] sm:$0x1] %v643_v5  ;;  %v645_v6 = vld [vmem:[%s542_s29] sm:$0x1]  ;;  %s2817_s23 = sld [smem:[#allocation75_spill]]  ;;  %s2819_s5 = sld [smem:[#allocation74_spill]] }
 0x1b6   : > { %646 = vst [vmem:[%s603_s18 + $0x6] sm:$0x1] %v645_v6  ;;  %s650_s0 = scalar_lea.sflag [#allocation6], %s601_s21  ;;  %s1399_s13 = scalar_lea.vmem %s2513_s2, 128 }
 0x1b7   : > { %p627_p9 = scmp.lt.s32.totalorder %s626_s11, 29  ;;  %p1400_p5 = scmp.ne.s32.totalorder %s2513_s2, %s1399_s13 }
 0x1b8   : > { %p2820_p7 = scmp.ne.s32.totalorder %s2816_s9, 0  ;;  %s1669_s14 = smov [#allocation16]  }
 0x1b9   : > { %s2909_s11 = smov (!%p627_p9, %s626_s11), 29  ;;  %s1403_s12 = sshll.u32 %s1669_s14, 4  ;;  %s1404_s12 = int_to_ptr.vmem [resolvable:$false] %s1403_s12 }
 0x1ba   : > { %p1401_p2 = pnand %p1400_p5, %p2820_p7  ;;  %s1405_s29 = scalar_lea.vmem %s1404_s12, 256 }
 0x1bb   : > { %s2818_s7 = smov %s2817_s23  ;;  %s2508_s27 = scalar_lea.hbm %s2817_s23, %s887_s30 }
 0x1bc   : > { %s629_s22 = scalar_lea.vmem %s2819_s5, %s2909_s11  ;;  %p1402_p6 = pneg %p1401_p2 }
 0x1bd   : > { %v647_v7 = vld [vmem:[%s629_s22] sm:$0x1]  ;;  %p1406_p4 = scmp.lt.s32.totalorder %s2513_s2, %s1404_s12  ;;  %p1407_p8 = scmp.lt.s32.totalorder %s1405_s29, %s1399_s13 }
 0x1be   : > { %648 = vst [vmem:[%s603_s18 + $0x7] sm:$0x1] %v647_v7 }
 0x1bf   : > { %p1408_p11 = por %p1407_p8, %p1406_p4 }
 0x1c1   : > { %p1409_p3 = pnand %p1408_p11, %p1402_p6 }
 0x1c3   : > { %1412 = shalt.err (!%p1409_p3)
}
 0x1c4   : > { %s1413_s21 = scalar_lea.hbm %s2508_s27, 128  ;;  %s1417_s17 = scalar_lea.hbm %s2818_s7, 256 }
 0x1c5   : > { %p1414_p1 = scmp.ne.s32.totalorder %s2508_s27, %s1413_s21  ;;  %p1418_p13 = scmp.lt.u32.totalorder %s2508_s27, %s2818_s7 }
 0x1c6   : > { %p1419_p12 = scmp.lt.u32.totalorder %s1417_s17, %s1413_s21  ;;  %p1421_p5 = scmp.lt.u32.totalorder %s1413_s21, %s2508_s27 }
 0x1c7   : > { %p1415_p10 = pnand %p1414_p1, %p2820_p7 }
 0x1c8   : > { %p1420_p9 = por %p1419_p12, %p1418_p13 }
 0x1c9   : > { %p1416_p0 = pneg %p1415_p10 }
 0x1ca   : > { %p1422_p2 = por %p1421_p5, %p1420_p9 }
 0x1cc   : > { %p1423_p6 = pnand %p1422_p2, %p1416_p0 }
 0x1ce   : > { %1426 = shalt.err (!%p1423_p6)
}
 0x1cf   : > { %934 = dma.vmem_to_hbm [thread:$0]  (%p2820_p7), %s2513_s2, 128, %s2508_s27, %s650_s0  }
 0x1d0 PF: > { %s2821_s30 = sld [smem:[#allocation41_spill]]  ;;  %s2822_s3 = sld [smem:[#allocation62_spill]] }
 0x1d1   : > { %s2823_s19 = sld [smem:[#allocation56_spill]] }
 0x1d6   : > { %s675_s23 = sand.u32 1, %s2821_s30   ;;  %p2824_p4 = scmp.ne.s32.totalorder %s2822_s3, 0 }
 0x1d7   : > { %p2825_p8 = scmp.ge.s32.totalorder %s2823_s19, 2  ;;  %s676_s28 = scalar_lea.sflag [#allocation6], %s675_s23 }
 0x1d9   : > { %p973_p11 = pnand %p2825_p8, %p2824_p4 }
 0x1db   : > { %1558 = dma.done.wait (!%p973_p11), %s676_s28, 128  }
 0x1dc   : > { %1560 = vsyncadd (!%p973_p11), %s676_s28, 4294967168  ;;  %s2826_s24 = sld [smem:[#allocation57_spill]]  ;;  %s2828_s22 = sld [smem:[#allocation42_spill]] }
 0x1dd   : > { %s2829_s21 = sld [smem:[#allocation60_spill]]  ;;  %s2830_s0 = sld [smem:[#allocation44_spill]] }
 0x1de   : > { %s2831_s9 = sld [smem:[#allocation45_spill]]  ;;  %s2832_s2 = sld [smem:[#allocation46_spill]] }
 0x1df   : > { %s2833_s26 = sld [smem:[#allocation64_spill]]  ;;  %s2834_s27 = sld [smem:[#allocation47_spill]] }
 0x1e0   : > { %s2835_s28 = sld [smem:[#allocation48_spill]]  ;;  %s2836_s29 = sld [smem:[#allocation40_spill]] }
 0x1e1   : > { %s2837_s13 = sld [smem:[#allocation49_spill]]  ;;  %s2839_s12 = sld [smem:[#allocation51_spill]] }
 0x1e2   : > { %s2827_s5 = smov %s2826_s24  ;;  %s2838_s11 = sld [smem:[#allocation63_spill]] }
 0x1e3   : > { %p35_p7 = scmp.ge.s32.totalorder %s2826_s24, 4   ;;  %s2840_s19 = smov %s1567_s20 }
 0x1e4   : > { %s2841_s14 = sld [smem:[#allocation52_spill]]  ;;  %s2842_s20 = smov %s2828_s22 }
 0x1e5   : > { %s2843_s1 = sld [smem:[#allocation66_spill]]  ;;  %s2845_s22 = smov %s2831_s9 }
 0x1e6   : > { %s2844_s17 = sld [smem:[#allocation53_spill]]  ;;  %s2846_s18 = sld [smem:[#allocation61_spill]] }
 0x1e7   : > { %s2847_s23 = smov %s2901_s15  ;;  %s2848_s24 = smov %s1591_s25 }
 0x1e8   : > { %s2849_s3 = sld [smem:[#allocation55_spill]]  ;;  %s2850_s25 = smov %s2832_s2 }
 0x1e9   : > { %s2851_s9 = sld [smem:[#allocation65_spill]]  ;;  %s2852_s30 = smov %s1615_s10 }
 0x1ea   : > { %s2853_s10 = smov %s2837_s13  ;;  %s2854_s13 = smov %s2841_s14 }
 0x1eb   : > { %s2855_s14 = smov %s2843_s1  ;;  %s2856_s15 = smov %s1639_s16 }
 0x1ec   : > { %s2857_s16 = smov %s2844_s17  ;;  %s2858_s17 = smov %s2846_s18 }
 0x1ed   : > { %s2859_s18 = smov %s1651_s8  ;;  %2861 = sst [smem:[#allocation40_spill]] %s2827_s5 }
 0x1ee   : > { %s2860_s8 = smov %s2849_s3  ;;  %37 = sbr.rel (!%p35_p7) target bundleno = 39 (0x27), region = 172 }
 0x1f5   :  { %681 = vsyncpa [#allocation5], 1 }
 0x1f6   :  { %683 = vsyncpa [#allocation5 + $0x1], 1 }
 0x1f7   :  { %684 = vsyncpa [#allocation8], 1 }
 0x1f8   :  { %686 = vsyncpa [#allocation8 + $0x1], 1 }
 0x1f9   :  { %687 = vsyncpa [#allocation11], 1 }
 0x1fa   :  { %689 = vsyncpa [#allocation11 + $0x1], 1 }
 0x1fb   :  { %690 = vsyncpa [#allocation14], 1 }
 0x1fc   :  { %692 = vsyncpa [#allocation14 + $0x1], 1 }
 0x1fd   :  { %693 = vsyncpa [#allocation6], 1 }
 0x1fe   :  { %695 = vsyncpa [#allocation6 + $0x1], 1 }

</bundles_post_ra>
